<compile_context>
chip_gen: v5e
topology: v5e:2x2
jax: 0.10.0
libtpu: 0.0.40
codegen_flags: <defaults>
</compile_context>

<pallas_src>
import jax
import jax.numpy as jnp
from jax.experimental import pallas as pl
from jax.experimental.pallas import tpu as pltpu

_LANE = 128


def _round_up(n, m):
    return ((n + m - 1) // m) * m


def _mlp_kernel(x_ref, w1_ref, b1_ref, w2_ref, b2_ref, w3_ref, b3_ref, o_ref):
    # All hidden dims are lane-padded to 128 on the host; pad columns carry
    # zero weights/biases so results are exact.
    x = x_ref[...]                                              # (tb, f_in) bf16
    h1 = jnp.dot(x, w1_ref[...], preferred_element_type=jnp.float32) + b1_ref[...]
    h1 = jnp.maximum(h1, 0.0)
    h2 = jnp.dot(h1.astype(w2_ref.dtype), w2_ref[...],
                 preferred_element_type=jnp.float32) + b2_ref[...]
    h2 = jnp.maximum(h2, 0.0)
    y = jnp.dot(h2.astype(w3_ref.dtype), w3_ref[...],
                preferred_element_type=jnp.float32) + b3_ref[...]
    o_ref[...] = y.astype(o_ref.dtype)


def discriminator_feat_forward(x, params, *, batch_tile=512,
                               stream_dtype=jnp.bfloat16,
                               vmem_limit_bytes=None):
    """Pallas TPU forward for Discriminator_feat.

    x: [B, f_in] (any float dtype; streamed as `stream_dtype`)
    params: prepared (lane-padded) params from `prepare_params`:
        w1 [f_in, H1p], b1 [1, H1p], w2 [H1p, H2p], b2 [1, H2p],
        w3 [H2p, 1],   b3 [1, 1]
    returns: [B, 1] float32
    """
    B, f_in = x.shape
    w1, b1, w2, b2, w3, b3 = (params["w1"], params["b1"], params["w2"],
                              params["b2"], params["w3"], params["b3"])
    assert w1.shape[0] == f_in, "w1 fan_in must match x feature dim"
    h1p, h2p, h3 = w1.shape[1], w2.shape[1], w3.shape[1]

    # Batch tile: multiple of 8, capped at the (rounded-up) batch size.
    tb = max(8, min(_round_up(batch_tile, 8), _round_up(B, 8)))
    b_pad = _round_up(B, tb)
    grid = (b_pad // tb,)

    xs = x.astype(stream_dtype)
    if b_pad != B:
        xs = jnp.pad(xs, ((0, b_pad - B), (0, 0)))

    in_specs = [
        pl.BlockSpec((tb, f_in), lambda i: (i, 0)),    # x tile (streamed)
        pl.BlockSpec((f_in, h1p), lambda i: (0, 0)),   # w1 (resident)
        pl.BlockSpec((1, h1p), lambda i: (0, 0)),      # b1
        pl.BlockSpec((h1p, h2p), lambda i: (0, 0)),    # w2
        pl.BlockSpec((1, h2p), lambda i: (0, 0)),      # b2
        pl.BlockSpec((h2p, h3), lambda i: (0, 0)),     # w3
        pl.BlockSpec((1, h3), lambda i: (0, 0)),       # b3
    ]
    out_spec = pl.BlockSpec((tb, h3), lambda i: (i, 0))

    out = pl.pallas_call(
        _mlp_kernel,
        out_shape=jax.ShapeDtypeStruct((b_pad, h3), jnp.float32),
        grid_spec=pltpu.PrefetchScalarGridSpec(
            num_scalar_prefetch=0,
            grid=grid,
            in_specs=in_specs,
            out_specs=out_spec,
        ),
        compiler_params=pltpu.CompilerParams(
            dimension_semantics=("parallel",),
            vmem_limit_bytes=vmem_limit_bytes,
        ),
    )(xs, w1, b1, w2, b2, w3, b3)

    return out[:B] if b_pad != B else out


def init_params(key, f_in):
    """PyTorch-Linear-style init; weights stored as [in, out] (transposed)."""
    k1, k2, k3, k4, k5, k6 = jax.random.split(key, 6)

    def linear_init(kw, kb, fan_in, fan_out):
        # U(-1/sqrt(fan_in), 1/sqrt(fan_in)), like nn.Linear default.
        bound = 1.0 / jnp.sqrt(jnp.float32(fan_in))
        w = jax.random.uniform(kw, (fan_in, fan_out), jnp.float32, -bound, bound)
        b = jax.random.uniform(kb, (1, fan_out), jnp.float32, -bound, bound)
        return w, b

    w1, b1 = linear_init(k1, k2, f_in, 100)
    w2, b2 = linear_init(k3, k4, 100, 50)
    w3, b3 = linear_init(k5, k6, 50, 1)
    return {"w1": w1, "b1": b1, "w2": w2, "b2": b2, "w3": w3, "b3": b3}


def prepare_params(params, *, weight_dtype=jnp.bfloat16, lane=_LANE):
    """Zero-pad hidden widths (100->128, 50->128) and cast weights for the MXU.

    Padding is exact: padded weight columns/rows and biases are zero, so padded
    hidden units are ReLU(0)=0 and contribute nothing to later layers.
    """
    w1, b1 = params["w1"], params["b1"]
    w2, b2 = params["w2"], params["b2"]
    w3, b3 = params["w3"], params["b3"]
    h1, h2 = w1.shape[1], w2.shape[1]
    h1p, h2p = _round_up(h1, lane), _round_up(h2, lane)

    w1p = jnp.pad(w1, ((0, 0), (0, h1p - h1))).astype(weight_dtype)
    b1p = jnp.pad(b1, ((0, 0), (0, h1p - h1))).astype(jnp.float32)
    w2p = jnp.pad(w2, ((0, h1p - h1), (0, h2p - h2))).astype(weight_dtype)
    b2p = jnp.pad(b2, ((0, 0), (0, h2p - h2))).astype(jnp.float32)
    w3p = jnp.pad(w3, ((0, h2p - h2), (0, 0))).astype(weight_dtype)
    b3p = b3.astype(jnp.float32)
    return {"w1": w1p, "b1": b1p, "w2": w2p, "b2": b2p, "w3": w3p, "b3": b3p}


def _reference_forward(x, p):
    """Pure-JAX f32 reference with the original (unpadded) params."""
    h1 = jnp.maximum(x @ p["w1"] + p["b1"], 0.0)
    h2 = jnp.maximum(h1 @ p["w2"] + p["b2"], 0.0)
    return h2 @ p["w3"] + p["b3"]


if __name__ == "__main__":
    key = jax.random.PRNGKey(0)
    kx, kp = jax.random.split(key)

    B, f_in = 256, 32
    x = jax.random.normal(kx, (B, f_in), jnp.float32)
    params = init_params(kp, f_in)
    packed = prepare_params(params, weight_dtype=jnp.bfloat16)

    # batch_tile=128 -> grid of 2 "parallel" steps (keeps both v7x TCs busy;
    # neutral on v5e/v6e).
    out = discriminator_feat_forward(x, packed, batch_tile=128,
                                     stream_dtype=jnp.bfloat16)
    out = jax.block_until_ready(out)

    ref = _reference_forward(x, params)
    assert out.shape == (B, 1)
    max_err = float(jnp.max(jnp.abs(out - ref)))
    # bf16 streaming of x/weights with f32 accumulation -> small quantization error.
    assert jnp.allclose(out, ref, atol=2e-2, rtol=2e-2), f"max_err={max_err}"

    print("KERNEL_OK")
</pallas_src>

<mosaic_0001>
module attributes {stable_mosaic.version = 11 : i64} {
  func.func @_mlp_kernel(%arg0: i32, %arg1: memref<128x32xbf16, #tpu.memory_space<vmem>>, %arg2: memref<32x128xbf16, #tpu.memory_space<vmem>>, %arg3: memref<1x128xf32, #tpu.memory_space<vmem>>, %arg4: memref<128x128xbf16, #tpu.memory_space<vmem>>, %arg5: memref<1x128xf32, #tpu.memory_space<vmem>>, %arg6: memref<128x1xbf16, #tpu.memory_space<vmem>>, %arg7: memref<1x1xf32, #tpu.memory_space<vmem>>, %arg8: memref<128x1xf32, #tpu.memory_space<vmem>>) attributes {dimension_semantics = [#tpu.dimension_semantics<parallel>], iteration_bounds = array<i64: 2>, scalar_prefetch = 0 : i64, scratch_operands = 0 : i64, tpu.core_type = #tpu.core_type<tc>, window_params = [{transform_indices = @transform_0, window_bounds = array<i64: 128, 32>}, {pipeline_mode = #tpu.pipeline_mode<synchronous>, transform_indices = @transform_1, window_bounds = array<i64: 32, 128>}, {pipeline_mode = #tpu.pipeline_mode<synchronous>, transform_indices = @transform_2, window_bounds = array<i64: 1, 128>}, {pipeline_mode = #tpu.pipeline_mode<synchronous>, transform_indices = @transform_3, window_bounds = array<i64: 128, 128>}, {pipeline_mode = #tpu.pipeline_mode<synchronous>, transform_indices = @transform_4, window_bounds = array<i64: 1, 128>}, {pipeline_mode = #tpu.pipeline_mode<synchronous>, transform_indices = @transform_5, window_bounds = array<i64: 128, 1>}, {pipeline_mode = #tpu.pipeline_mode<synchronous>, transform_indices = @transform_6, window_bounds = array<i64: 1, 1>}, {transform_indices = @transform_7, window_bounds = array<i64: 128, 1>}]} {
    %c0 = arith.constant 0 : index
    %c0_0 = arith.constant 0 : index
    %0 = vector.load %arg1[%c0, %c0_0] : memref<128x32xbf16, #tpu.memory_space<vmem>>, vector<128x32xbf16>
    %c0_1 = arith.constant 0 : index
    %c0_2 = arith.constant 0 : index
    %1 = vector.load %arg2[%c0_1, %c0_2] : memref<32x128xbf16, #tpu.memory_space<vmem>>, vector<32x128xbf16>
    %cst = arith.constant dense<0.000000e+00> : vector<128x128xf32>
    %2 = tpu.matmul %0, %1, %cst {dimension_numbers = #tpu.dot_dimension_numbers<[1], [0], [0], [1], [0, 0, 1, 1], [], []>} : vector<128x32xbf16>, vector<32x128xbf16>, vector<128x128xf32> -> vector<128x128xf32>
    %c0_3 = arith.constant 0 : index
    %c0_4 = arith.constant 0 : index
    %3 = vector.load %arg3[%c0_3, %c0_4] : memref<1x128xf32, #tpu.memory_space<vmem>>, vector<1x128xf32>
    %4 = vector.broadcast %3 : vector<1x128xf32> to vector<128x128xf32>
    %5 = arith.addf %2, %4 : vector<128x128xf32>
    %cst_5 = arith.constant 0.000000e+00 : f32
    %6 = vector.broadcast %cst_5 : f32 to vector<128x128xf32>
    %7 = arith.maximumf %5, %6 : vector<128x128xf32>
    %8 = arith.truncf %7 : vector<128x128xf32> to vector<128x128xbf16>
    %c0_6 = arith.constant 0 : index
    %c0_7 = arith.constant 0 : index
    %9 = vector.load %arg4[%c0_6, %c0_7] : memref<128x128xbf16, #tpu.memory_space<vmem>>, vector<128x128xbf16>
    %cst_8 = arith.constant dense<0.000000e+00> : vector<128x128xf32>
    %10 = tpu.matmul %8, %9, %cst_8 {dimension_numbers = #tpu.dot_dimension_numbers<[1], [0], [0], [1], [0, 0, 1, 1], [], []>} : vector<128x128xbf16>, vector<128x128xbf16>, vector<128x128xf32> -> vector<128x128xf32>
    %c0_9 = arith.constant 0 : index
    %c0_10 = arith.constant 0 : index
    %11 = vector.load %arg5[%c0_9, %c0_10] : memref<1x128xf32, #tpu.memory_space<vmem>>, vector<1x128xf32>
    %12 = vector.broadcast %11 : vector<1x128xf32> to vector<128x128xf32>
    %13 = arith.addf %10, %12 : vector<128x128xf32>
    %cst_11 = arith.constant 0.000000e+00 : f32
    %14 = vector.broadcast %cst_11 : f32 to vector<128x128xf32>
    %15 = arith.maximumf %13, %14 : vector<128x128xf32>
    %16 = arith.truncf %15 : vector<128x128xf32> to vector<128x128xbf16>
    %c0_12 = arith.constant 0 : index
    %c0_13 = arith.constant 0 : index
    %17 = vector.load %arg6[%c0_12, %c0_13] : memref<128x1xbf16, #tpu.memory_space<vmem>>, vector<128x1xbf16>
    %cst_14 = arith.constant dense<0.000000e+00> : vector<128x1xf32>
    %18 = tpu.matmul %16, %17, %cst_14 {dimension_numbers = #tpu.dot_dimension_numbers<[1], [0], [0], [1], [0, 0, 1, 1], [], []>} : vector<128x128xbf16>, vector<128x1xbf16>, vector<128x1xf32> -> vector<128x1xf32>
    %c0_15 = arith.constant 0 : index
    %c0_16 = arith.constant 0 : index
    %19 = vector.load %arg7[%c0_15, %c0_16] : memref<1x1xf32, #tpu.memory_space<vmem>>, vector<1x1xf32>
    %20 = vector.broadcast %19 : vector<1x1xf32> to vector<128x1xf32>
    %21 = arith.addf %18, %20 : vector<128x1xf32>
    %c0_17 = arith.constant 0 : index
    %c0_18 = arith.constant 0 : index
    %22 = vector.load %arg8[%c0_17, %c0_18] : memref<128x1xf32, #tpu.memory_space<vmem>>, vector<128x1xf32>
    tpu.vector_store %arg8[%c0_17, %c0_18], %21 {strides = array<i32>} : memref<128x1xf32, #tpu.memory_space<vmem>>, vector<128x1xf32>,
    return
  }
  func.func @transform_0(%arg0: i32) -> (i32, i32) {
    %c0_i32 = arith.constant 0 : i32
    %c0_i32_0 = arith.constant 0 : i32
    return %arg0, %c0_i32 : i32, i32
  }
  func.func @transform_1(%arg0: i32) -> (i32, i32) {
    %c0_i32 = arith.constant 0 : i32
    %c0_i32_0 = arith.constant 0 : i32
    %c0_i32_1 = arith.constant 0 : i32
    return %c0_i32, %c0_i32_0 : i32, i32
  }
  func.func @transform_2(%arg0: i32) -> (i32, i32) {
    %c0_i32 = arith.constant 0 : i32
    %c0_i32_0 = arith.constant 0 : i32
    %c0_i32_1 = arith.constant 0 : i32
    return %c0_i32, %c0_i32_0 : i32, i32
  }
  func.func @transform_3(%arg0: i32) -> (i32, i32) {
    %c0_i32 = arith.constant 0 : i32
    %c0_i32_0 = arith.constant 0 : i32
    %c0_i32_1 = arith.constant 0 : i32
    return %c0_i32, %c0_i32_0 : i32, i32
  }
  func.func @transform_4(%arg0: i32) -> (i32, i32) {
    %c0_i32 = arith.constant 0 : i32
    %c0_i32_0 = arith.constant 0 : i32
    %c0_i32_1 = arith.constant 0 : i32
    return %c0_i32, %c0_i32_0 : i32, i32
  }
  func.func @transform_5(%arg0: i32) -> (i32, i32) {
    %c0_i32 = arith.constant 0 : i32
    %c0_i32_0 = arith.constant 0 : i32
    %c0_i32_1 = arith.constant 0 : i32
    return %c0_i32, %c0_i32_0 : i32, i32
  }
  func.func @transform_6(%arg0: i32) -> (i32, i32) {
    %c0_i32 = arith.constant 0 : i32
    %c0_i32_0 = arith.constant 0 : i32
    %c0_i32_1 = arith.constant 0 : i32
    return %c0_i32, %c0_i32_0 : i32, i32
  }
  func.func @transform_7(%arg0: i32) -> (i32, i32) {
    %c0_i32 = arith.constant 0 : i32
    %c0_i32_0 = arith.constant 0 : i32
    return %arg0, %c0_i32 : i32, i32
  }
}

</mosaic_0001>

<bundles_post_ra>
// kernel: tpu_custom_call.1
= control target key start
LH: loop header
LB: loop body
LE: loop exit
PB: predicated region body
PF: predicated region fallthrough
CT: control target
= control target key end

     0   :  { %s1017_s26 = smov 0   ;;  %s1168_s0 = inlined_call_operand.vmem [shape: bf16[256,32], index: 0, kind: input, shape index: {}]   ;;  %s1169_s1 = inlined_call_operand.vmem [shape: bf16[32,128], index: 1, kind: input, shape index: {}]   ;;  %s1170_s2 = inlined_call_operand.vmem [shape: f32[1,128], index: 2, kind: input, shape index: {}]   ;;  %s1171_s3 = inlined_call_operand.vmem [shape: bf16[128,128], index: 3, kind: input, shape index: {}]   ;;  %s1172_s4 = inlined_call_operand.vmem [shape: f32[1,128], index: 4, kind: input, shape index: {}]   ;;  %s1173_s5 = inlined_call_operand.vmem [shape: bf16[128,1], index: 5, kind: input, shape index: {}]   ;;  %s1174_s6 = inlined_call_operand.<no memory space> [shape: f32[1,1], index: 6, kind: input, shape index: {}]   ;;  %s1175_s7 = inlined_call_operand.vmem [shape: f32[256,1], index: 7, kind: output, shape index: {}]  }
   0x1   :  { %v12_v0 = vstv %s1174_s6 }
   0x2   :  { %13 = vst [vmem:[#allocation2] sm:$0x1] %v12_v0 }
   0x3 LB: > { %s790_s27 = sadd.s32 4294967295, %s972_s26   ;;  %p794_p0 = scmp.ge.s32.totalorder %s972_s26, 1  ;;  %s972_s26 = sphi %s1017_s26, %s19_s26  }
   0x4   : > { %p240_p1 = scmp.lt.s32.totalorder %s972_s26, 3 }
   0x6   : > { %p241_p2 = pnand %p794_p0, %p240_p1 }
   0x7   : > { %s795_s6 = sshll.u32 (!%p241_p2), %s790_s27, 4 }
   0x8   : > { %244 = sbr.rel (%p241_p2) target bundleno = 562 (0x232), region = 48  ;;  %p273_p3 = scmp.lt.s32.totalorder (!%p241_p2), %s795_s6, 31 }
   0xd   : > { %v922_v1 = vld [vmem:[%s1169_s1 + $0x8] sm:$0xff]  ;;  %v921_v2 = vld [vmem:[%s1169_s1] sm:$0xff]  ;;  %s1177_s6 = smov (!%p273_p3, %s795_s6), 31  ;;  %vm361_vm0 = vcmask 261120   ;;  %v930_v8 = vld [vmem:[%s1171_s3 + $0x38] sm:$0xff]  ;;  %vm717_vm1 = vcmask 7168  }
   0xe   : > { %392 = vmatpush.bf16.msra.mxu0 %v922_v1  ;;  %s796_s9 = sshll.u32 %s1177_s6, 2  ;;  %527 = vmatpush.bf16.msra.mxu1 %v930_v8  ;;  %v929_v10 = vld [vmem:[%s1171_s3 + $0x30] sm:$0xff]  ;;  %v928_v11 = vld [vmem:[%s1171_s3 + $0x28] sm:$0xff]  ;;  %v927_v12 = vld [vmem:[%s1171_s3 + $0x20] sm:$0xff]  ;;  %s798_s28 = sshll.u32 %s1177_s6, 3 }
   0xf   : > { %s1037_s12 = scalar_lea.vmem %s1168_s0, %s796_s9  ;;  %939 = vmatpush.bf16.msra.mxu3 %v930_v8  ;;  %v926_v13 = vld [vmem:[%s1171_s3 + $0x18] sm:$0xff]  ;;  %v925_v15 = vld [vmem:[%s1171_s3 + $0x10] sm:$0xff]  ;;  %v924_v16 = vld [vmem:[%s1171_s3 + $0x8] sm:$0xff]  ;;  %s1131_s8 = scalar_lea.vmem %s1175_s7, %s798_s28 }
  0x10   : > { %v913_v3 = vld [vmem:[%s1037_s12] sm:$0xff]  ;;  %v914_v4 = vld [vmem:[%s1037_s12 + $0x8] sm:$0xff]  ;;  %v915_v5 = vld [vmem:[%s1037_s12 + $0x10] sm:$0xff] }
  0x11   : > { %v916_v6 = vld [vmem:[%s1037_s12 + $0x18] sm:$0xff]  ;;  %v917_v7 = vld [vmem:[%s1037_s12 + $0x20] sm:$0xff]  ;;  %v918_v9 = vld [vmem:[%s1037_s12 + $0x28] sm:$0xff] }
  0x12   : > { %393 = vmatpush.bf16.msra.mxu0 %v921_v2  ;;  %528 = vmatpush.bf16.msra.mxu1 %v929_v10  ;;  %v919_v14 = vld [vmem:[%s1037_s12 + $0x30] sm:$0xff]  ;;  %v923_v17 = vld [vmem:[%s1171_s3] sm:$0xff]  ;;  %v920_v18 = vld [vmem:[%s1037_s12 + $0x38] sm:$0xff] }
  0x13   : > { %940 = vmatpush.bf16.msra.mxu3 %v929_v10  ;;  %v1082_v20 = vld [vmem:[%s1170_s2] ss:$0 sm:$0xff]  ;;  %v938_v59 = vld [vmem:[%s1173_s5 + $0x38] sm:$0xff]  ;;  %v937_v63 = vld [vmem:[%s1173_s5 + $0x30] sm:$0xff] }
  0x14   : > { %668 = vmatpush.bf16.msra.mxu2 %v938_v59  ;;  %v936_v1 = vld [vmem:[%s1173_s5 + $0x28] sm:$0xff]  ;;  %v935_v2 = vld [vmem:[%s1173_s5 + $0x20] sm:$0xff]  ;;  %v933_v10 = vld [vmem:[%s1173_s5 + $0x10] sm:$0xff] }
  0x15   : > { %839 = vmatmul.msk.bf16.vlgmr.msra.gmra.mxu0 %vm361_vm0, %v913_v3 }
  0x16   : > { %529 = vmatpush.bf16.msra.mxu1 %v928_v11 }
  0x17   : > { %941 = vmatpush.bf16.msra.mxu3 %v928_v11 }
  0x18   : > { %669 = vmatpush.bf16.msra.mxu2 %v937_v63 }
  0x1a   : > { %530 = vmatpush.bf16.msra.mxu1 %v927_v12 }
  0x1b   : > { %942 = vmatpush.bf16.msra.mxu3 %v927_v12  ;;  %v932_v12 = vld [vmem:[%s1173_s5 + $0x8] sm:$0xff] }
  0x1c   : > { %670 = vmatpush.bf16.msra.mxu2 %v936_v1 }
  0x1e   : > { %531 = vmatpush.bf16.msra.mxu1 %v926_v13 }
  0x1f   : > { %943 = vmatpush.bf16.msra.mxu3 %v926_v13  ;;  %v931_v13 = vld [vmem:[%s1173_s5] sm:$0xff] }
  0x20   : > { %671 = vmatpush.bf16.msra.mxu2 %v935_v2 }
  0x22   : > { %532 = vmatpush.bf16.msra.mxu1 %v925_v15 }
  0x23   : > { %944 = vmatpush.bf16.msra.mxu3 %v925_v15 }
  0x25   : > { %840 = vmatmul.msk.bf16.gmra.mxu0 %vm361_vm0, %v914_v4 }
  0x26   : > { %533 = vmatpush.bf16.msra.mxu1 %v924_v16 }
  0x27   : > { %945 = vmatpush.bf16.msra.mxu3 %v924_v16 }
  0x2a   : > { %534 = vmatpush.bf16.msra.mxu1 %v923_v17 }
  0x2b   : > { %946 = vmatpush.bf16.msra.mxu3 %v923_v17 }
  0x2f   : > { %947 = vmatpush.bf16.msrb.mxu3 %v938_v59 }
  0x33   : > { %948 = vmatpush.bf16.msrb.mxu3 %v937_v63 }
  0x35   : > { %841 = vmatmul.msk.bf16.gmra.mxu0 %vm361_vm0, %v915_v5 }
  0x37   : > { %949 = vmatpush.bf16.msrb.mxu3 %v936_v1 }
  0x3b   : > { %950 = vmatpush.bf16.msrb.mxu3 %v935_v2 }
  0x45   : > { %842 = vmatmul.msk.bf16.gmra.mxu0 %vm361_vm0, %v916_v6  ;;  %v934_v6 = vld [vmem:[%s1173_s5 + $0x18] sm:$0xff] }
  0x46   : > { %672 = vmatpush.bf16.msra.mxu2 %v934_v6  ;;  %951 = vmatpush.bf16.msrb.mxu3 %v934_v6 }
  0x4a   : > { %673 = vmatpush.bf16.msra.mxu2 %v933_v10  ;;  %952 = vmatpush.bf16.msrb.mxu3 %v933_v10 }
  0x4e   : > { %674 = vmatpush.bf16.msra.mxu2 %v932_v12  ;;  %953 = vmatpush.bf16.msrb.mxu3 %v932_v12 }
  0x52   : > { %675 = vmatpush.bf16.msra.mxu2 %v931_v13  ;;  %954 = vmatpush.bf16.msrb.mxu3 %v931_v13  ;;  %v965_v13 = vld [vmem:[#allocation2] ss:$0 sm:$0xff] }
  0x55   : > { %843 = vmatmul.msk.bf16.gmra.mxu0 %vm361_vm0, %v917_v7 }
  0x65   : > { %844 = vmatmul.msk.bf16.gmra.mxu0 %vm361_vm0, %v918_v9 }
  0x75   : > { %845 = vmatmul.msk.bf16.gmra.mxu0 %vm361_vm0, %v919_v14 }
  0x85   : > { %846 = vmatmul.msk.bf16.gmra.mxu0 %vm361_vm0, %v920_v18 }
  0x92   : > { %v395_v19 = vpop.f32.mrf.mxu0 }
  0x93   : > { %v396_v21 = vadd.f32 %v1082_v20, %v395_v19 }
  0x95   : > { %v435_v24 = vmax.f32 %v396_v21, 0.0 }
  0x9a   : > { %v397_v22 = vpop.f32.mrf.mxu0 }
  0x9b   : > { %v398_v23 = vadd.f32 %v1082_v20, %v397_v22  ;;  %v964_v22 = vld [vmem:[%s1172_s4] ss:$0 sm:$0xff] }
  0x9d   : > { %v436_v25 = vmax.f32 %v398_v23, 0.0 }
  0x9f   : > { %v451_v26 = vpack.c.bf16 %v436_v25, %v435_v24 }
  0xa1   : > { %535 = vmatmul.bf16.vlgmr.msra.gmra.mxu1 %v451_v26 }
  0xa2   : > { %v400_v27 = vpop.f32.mrf.mxu0 }
  0xa3   : > { %v401_v28 = vadd.f32 %v1082_v20, %v400_v27 }
  0xa5   : > { %v437_v31 = vmax.f32 %v401_v28, 0.0 }
  0xaa   : > { %v402_v29 = vpop.f32.mrf.mxu0 }
  0xab   : > { %v403_v30 = vadd.f32 %v1082_v20, %v402_v29 }
  0xad   : > { %v438_v32 = vmax.f32 %v403_v30, 0.0 }
  0xaf   : > { %v452_v33 = vpack.c.bf16 %v438_v32, %v437_v31 }
  0xb1   : > { %540 = vmatmul.bf16.gmra.mxu1 %v452_v33 }
  0xb2   : > { %v405_v34 = vpop.f32.mrf.mxu0 }
  0xb3   : > { %v406_v35 = vadd.f32 %v1082_v20, %v405_v34 }
  0xb5   : > { %v439_v38 = vmax.f32 %v406_v35, 0.0 }
  0xba   : > { %v407_v36 = vpop.f32.mrf.mxu0 }
  0xbb   : > { %v408_v37 = vadd.f32 %v1082_v20, %v407_v36 }
  0xbd   : > { %v440_v39 = vmax.f32 %v408_v37, 0.0 }
  0xbf   : > { %v453_v40 = vpack.c.bf16 %v440_v39, %v439_v38 }
  0xc1   : > { %545 = vmatmul.bf16.gmra.mxu1 %v453_v40 }
  0xc2   : > { %v410_v41 = vpop.f32.mrf.mxu0 }
  0xc3   : > { %v411_v42 = vadd.f32 %v1082_v20, %v410_v41 }
  0xc5   : > { %v441_v45 = vmax.f32 %v411_v42, 0.0 }
  0xca   : > { %v412_v43 = vpop.f32.mrf.mxu0 }
  0xcb   : > { %v413_v44 = vadd.f32 %v1082_v20, %v412_v43 }
  0xcd   : > { %v442_v46 = vmax.f32 %v413_v44, 0.0 }
  0xcf   : > { %v454_v47 = vpack.c.bf16 %v442_v46, %v441_v45 }
  0xd1   : > { %550 = vmatmul.bf16.gmra.mxu1 %v454_v47 }
  0xd2   : > { %v415_v48 = vpop.f32.mrf.mxu0 }
  0xd3   : > { %v416_v49 = vadd.f32 %v1082_v20, %v415_v48 }
  0xd5   : > { %v443_v52 = vmax.f32 %v416_v49, 0.0 }
  0xda   : > { %v417_v50 = vpop.f32.mrf.mxu0 }
  0xdb   : > { %v418_v51 = vadd.f32 %v1082_v20, %v417_v50 }
  0xdd   : > { %v444_v53 = vmax.f32 %v418_v51, 0.0 }
  0xdf   : > { %v455_v54 = vpack.c.bf16 %v444_v53, %v443_v52 }
  0xe1   : > { %555 = vmatmul.bf16.gmra.mxu1 %v455_v54 }
  0xe2   : > { %v420_v55 = vpop.f32.mrf.mxu0 }
  0xe3   : > { %v421_v56 = vadd.f32 %v1082_v20, %v420_v55 }
  0xe5   : > { %v445_v60 = vmax.f32 %v421_v56, 0.0 }
  0xea   : > { %v422_v57 = vpop.f32.mrf.mxu0 }
  0xeb   : > { %v423_v58 = vadd.f32 %v1082_v20, %v422_v57 }
  0xed   : > { %v446_v61 = vmax.f32 %v423_v58, 0.0 }
  0xef   : > { %v456_v62 = vpack.c.bf16 %v446_v61, %v445_v60 }
  0xf1   : > { %560 = vmatmul.bf16.gmra.mxu1 %v456_v62 }
  0xf2   : > { %v425_v0 = vpop.f32.mrf.mxu0 }
  0xf3   : > { %v426_v3 = vadd.f32 %v1082_v20, %v425_v0 }
  0xf5   : > { %v447_v7 = vmax.f32 %v426_v3, 0.0 }
  0xfa   : > { %v427_v4 = vpop.f32.mrf.mxu0 }
  0xfb   : > { %v428_v5 = vadd.f32 %v1082_v20, %v427_v4 }
  0xfd   : > { %v448_v8 = vmax.f32 %v428_v5, 0.0 }
  0xff   : > { %v457_v9 = vpack.c.bf16 %v448_v8, %v447_v7 }
 0x101   : > { %565 = vmatmul.bf16.vlgmr.msra.gmra.mxu3 %v457_v9 }
 0x102   : > { %v430_v11 = vpop.f32.mrf.mxu0 }
 0x103   : > { %v431_v14 = vadd.f32 %v1082_v20, %v430_v11 }
 0x105   : > { %v449_v17 = vmax.f32 %v431_v14, 0.0 }
 0x10a   : > { %v432_v15 = vpop.f32.mrf.mxu0 }
 0x10b   : > { %v433_v16 = vadd.f32 %v1082_v20, %v432_v15 }
 0x10d   : > { %v450_v18 = vmax.f32 %v433_v16, 0.0 }
 0x10f   : > { %v458_v19 = vpack.c.bf16 %v450_v18, %v449_v17 }
 0x111   : > { %570 = vmatmul.bf16.gmra.mxu3 %v458_v19 }
 0x11e   : > { %v536_v21 = vpop.f32.mrf.mxu1 }
 0x11f   : > { %v537_v23 = vadd.f32 %v964_v22, %v536_v21 }
 0x121   : > { %v576_v26 = vmax.f32 %v537_v23, 0.0 }
 0x126   : > { %v538_v24 = vpop.f32.mrf.mxu1 }
 0x127   : > { %v539_v25 = vadd.f32 %v964_v22, %v538_v24 }
 0x129   : > { %v577_v27 = vmax.f32 %v539_v25, 0.0 }
 0x12b   : > { %v592_v28 = vpack.c.bf16 %v577_v27, %v576_v26 }
 0x12d   : > { %676 = vmatmul.bf16.vlgmr.msra.gmra.mxu2 %v592_v28 }
 0x12e   : > { %v541_v29 = vpop.f32.mrf.mxu1 }
 0x12f   : > { %v542_v30 = vadd.f32 %v964_v22, %v541_v29 }
 0x131   : > { %v578_v32 = vmax.f32 %v542_v30, 0.0 }
 0x136   : > { %v543_v31 = vpop.f32.mrf.mxu1 }
 0x137   : > { %v544_v20 = vadd.f32 %v964_v22, %v543_v31 }
 0x139   : > { %v579_v33 = vmax.f32 %v544_v20, 0.0 }
 0x13b   : > { %v593_v34 = vpack.c.bf16 %v579_v33, %v578_v32 }
 0x13d   : > { %681 = vmatmul.bf16.gmra.mxu2 %v593_v34 }
 0x13e   : > { %v546_v35 = vpop.f32.mrf.mxu1 }
 0x13f   : > { %v547_v36 = vadd.f32 %v964_v22, %v546_v35 }
 0x141   : > { %v580_v39 = vmax.f32 %v547_v36, 0.0 }
 0x146   : > { %v548_v37 = vpop.f32.mrf.mxu1 }
 0x147   : > { %v549_v38 = vadd.f32 %v964_v22, %v548_v37 }
 0x149   : > { %v581_v40 = vmax.f32 %v549_v38, 0.0 }
 0x14b   : > { %v594_v41 = vpack.c.bf16 %v581_v40, %v580_v39 }
 0x14d   : > { %686 = vmatmul.bf16.gmra.mxu2 %v594_v41 }
 0x14e   : > { %v551_v42 = vpop.f32.mrf.mxu1 }
 0x14f   : > { %v552_v43 = vadd.f32 %v964_v22, %v551_v42 }
 0x151   : > { %v582_v46 = vmax.f32 %v552_v43, 0.0 }
 0x156   : > { %v553_v44 = vpop.f32.mrf.mxu1 }
 0x157   : > { %v554_v45 = vadd.f32 %v964_v22, %v553_v44 }
 0x159   : > { %v583_v47 = vmax.f32 %v554_v45, 0.0 }
 0x15b   : > { %v595_v48 = vpack.c.bf16 %v583_v47, %v582_v46 }
 0x15d   : > { %691 = vmatmul.bf16.gmra.mxu2 %v595_v48 }
 0x15e   : > { %v556_v49 = vpop.f32.mrf.mxu1 }
 0x15f   : > { %v557_v50 = vadd.f32 %v964_v22, %v556_v49 }
 0x161   : > { %v584_v53 = vmax.f32 %v557_v50, 0.0 }
 0x166   : > { %v558_v51 = vpop.f32.mrf.mxu1 }
 0x167   : > { %v559_v52 = vadd.f32 %v964_v22, %v558_v51 }
 0x169   : > { %v585_v54 = vmax.f32 %v559_v52, 0.0 }
 0x16b   : > { %v596_v55 = vpack.c.bf16 %v585_v54, %v584_v53 }
 0x16d   : > { %696 = vmatmul.bf16.gmra.mxu2 %v596_v55 }
 0x16e   : > { %v561_v56 = vpop.f32.mrf.mxu1 }
 0x16f   : > { %v562_v57 = vadd.f32 %v964_v22, %v561_v56 }
 0x171   : > { %v586_v60 = vmax.f32 %v562_v57, 0.0 }
 0x176   : > { %v563_v58 = vpop.f32.mrf.mxu1 }
 0x177   : > { %v564_v59 = vadd.f32 %v964_v22, %v563_v58 }
 0x179   : > { %v587_v61 = vmax.f32 %v564_v59, 0.0 }
 0x17b   : > { %v597_v62 = vpack.c.bf16 %v587_v61, %v586_v60 }
 0x17d   : > { %701 = vmatmul.bf16.gmra.mxu2 %v597_v62 }
 0x184   : > { %v566_v63 = vpop.f32.mrf.mxu3 }
 0x185   : > { %v567_v0 = vadd.f32 %v964_v22, %v566_v63 }
 0x187   : > { %v588_v3 = vmax.f32 %v567_v0, 0.0 }
 0x18c   : > { %v568_v1 = vpop.f32.mrf.mxu3 }
 0x18d   : > { %v569_v2 = vadd.f32 %v964_v22, %v568_v1 }
 0x18f   : > { %v589_v4 = vmax.f32 %v569_v2, 0.0 }
 0x191   : > { %v598_v5 = vpack.c.bf16 %v589_v4, %v588_v3 }
 0x193   : > { %706 = vmatmul.bf16.vlgmr.msrb.gmra.mxu3 %v598_v5 }
 0x194   : > { %v571_v6 = vpop.f32.mrf.mxu3 }
 0x195   : > { %v572_v7 = vadd.f32 %v964_v22, %v571_v6 }
 0x197   : > { %v590_v10 = vmax.f32 %v572_v7, 0.0 }
 0x19c   : > { %v573_v8 = vpop.f32.mrf.mxu3 }
 0x19d   : > { %v574_v9 = vadd.f32 %v964_v22, %v573_v8 }
 0x19f   : > { %v591_v11 = vmax.f32 %v574_v9, 0.0 }
 0x1a1   : > { %v599_v12 = vpack.c.bf16 %v591_v11, %v590_v10 }
 0x1a3   : > { %711 = vmatmul.bf16.gmra.mxu3 %v599_v12 }
 0x1b0   : > { %v677_v14 = vpop.f32.mrf.mxu2 }
 0x1b1   : > { %v678_v15 = vadd.f32 %v965_v13, %v677_v14 }
 0x1b3   : > { %718 = vst.msk [vmem:[%s1131_s8] sm:$0xff] %vm717_vm1, %v678_v15 }
 0x1b8   : > { %v679_v16 = vpop.f32.mrf.mxu2 }
 0x1b9   : > { %v680_v17 = vadd.f32 %v965_v13, %v679_v16 }
 0x1bb   : > { %719 = vst.msk [vmem:[%s1131_s8 + $0x8] sm:$0xff] %vm717_vm1, %v680_v17 }
 0x1c0   : > { %v682_v18 = vpop.f32.mrf.mxu2 }
 0x1c1   : > { %v683_v19 = vadd.f32 %v965_v13, %v682_v18 }
 0x1c3   : > { %720 = vst.msk [vmem:[%s1131_s8 + $0x10] sm:$0xff] %vm717_vm1, %v683_v19 }
 0x1c8   : > { %v684_v21 = vpop.f32.mrf.mxu2 }
 0x1c9   : > { %v685_v22 = vadd.f32 %v965_v13, %v684_v21 }
 0x1cb   : > { %721 = vst.msk [vmem:[%s1131_s8 + $0x18] sm:$0xff] %vm717_vm1, %v685_v22 }
 0x1d0   : > { %v687_v23 = vpop.f32.mrf.mxu2 }
 0x1d1   : > { %v688_v24 = vadd.f32 %v965_v13, %v687_v23 }
 0x1d3   : > { %722 = vst.msk [vmem:[%s1131_s8 + $0x20] sm:$0xff] %vm717_vm1, %v688_v24 }
 0x1d8   : > { %v689_v25 = vpop.f32.mrf.mxu2 }
 0x1d9   : > { %v690_v26 = vadd.f32 %v965_v13, %v689_v25 }
 0x1db   : > { %723 = vst.msk [vmem:[%s1131_s8 + $0x28] sm:$0xff] %vm717_vm1, %v690_v26 }
 0x1e0   : > { %v692_v27 = vpop.f32.mrf.mxu2 }
 0x1e1   : > { %v693_v28 = vadd.f32 %v965_v13, %v692_v27 }
 0x1e3   : > { %724 = vst.msk [vmem:[%s1131_s8 + $0x30] sm:$0xff] %vm717_vm1, %v693_v28 }
 0x1e8   : > { %v694_v29 = vpop.f32.mrf.mxu2 }
 0x1e9   : > { %v695_v30 = vadd.f32 %v965_v13, %v694_v29 }
 0x1eb   : > { %725 = vst.msk [vmem:[%s1131_s8 + $0x38] sm:$0xff] %vm717_vm1, %v695_v30 }
 0x1f0   : > { %v697_v31 = vpop.f32.mrf.mxu2 }
 0x1f1   : > { %v698_v20 = vadd.f32 %v965_v13, %v697_v31 }
 0x1f3   : > { %726 = vst.msk [vmem:[%s1131_s8 + $0x40] sm:$0xff] %vm717_vm1, %v698_v20 }
 0x1f8   : > { %v699_v32 = vpop.f32.mrf.mxu2 }
 0x1f9   : > { %v700_v33 = vadd.f32 %v965_v13, %v699_v32 }
 0x1fb   : > { %727 = vst.msk [vmem:[%s1131_s8 + $0x48] sm:$0xff] %vm717_vm1, %v700_v33 }
 0x200   : > { %v702_v34 = vpop.f32.mrf.mxu2 }
 0x201   : > { %v703_v35 = vadd.f32 %v965_v13, %v702_v34 }
 0x203   : > { %728 = vst.msk [vmem:[%s1131_s8 + $0x50] sm:$0xff] %vm717_vm1, %v703_v35 }
 0x208   : > { %v704_v36 = vpop.f32.mrf.mxu2 }
 0x209   : > { %v705_v37 = vadd.f32 %v965_v13, %v704_v36 }
 0x20b   : > { %729 = vst.msk [vmem:[%s1131_s8 + $0x58] sm:$0xff] %vm717_vm1, %v705_v37 }
 0x216   : > { %v707_v38 = vpop.f32.mrf.mxu3 }
 0x217   : > { %v708_v39 = vadd.f32 %v965_v13, %v707_v38 }
 0x219   : > { %730 = vst.msk [vmem:[%s1131_s8 + $0x60] sm:$0xff] %vm717_vm1, %v708_v39 }
 0x21e   : > { %v709_v40 = vpop.f32.mrf.mxu3 }
 0x21f   : > { %v710_v41 = vadd.f32 %v965_v13, %v709_v40 }
 0x221   : > { %731 = vst.msk [vmem:[%s1131_s8 + $0x68] sm:$0xff] %vm717_vm1, %v710_v41 }
 0x226   : > { %v712_v42 = vpop.f32.mrf.mxu3 }
 0x227   : > { %v713_v43 = vadd.f32 %v965_v13, %v712_v42 }
 0x229   : > { %732 = vst.msk [vmem:[%s1131_s8 + $0x70] sm:$0xff] %vm717_vm1, %v713_v43 }
 0x22e   : > { %v714_v44 = vpop.f32.mrf.mxu3 }
 0x22f   : > { %v715_v45 = vadd.f32 %v965_v13, %v714_v44 }
 0x231   : > { %733 = vst.msk [vmem:[%s1131_s8 + $0x78] sm:$0xff] %vm717_vm1, %v715_v45 }
 0x232 PF: > { %s19_s26 = sadd.s32 1, %s972_s26  }
 0x233   : > { %p16_p4 = scmp.ge.s32.totalorder %s19_s26, 4  }
 0x235   :  { %18 = sbr.rel (!%p16_p4) target bundleno = 3 (0x3), region = 78 }

</bundles_post_ra>
